<compile_context>
chip_gen: v6e
topology: v6e:2x2x1
jax: 0.10.0
libtpu: 0.0.40
codegen_flags: <defaults>
</compile_context>

<pallas_src>
import math

import jax
import jax.numpy as jnp
from jax.experimental import pallas as pl
from jax.experimental.pallas import tpu as pltpu

LANES = 128
MAX_TILE_ROWS = 4096          # (4096, 128) f32 = 2 MiB per input block
EPS = 1e-8
_SDR_SCALE = 10.0 / math.log(10.0)   # 10 * log10(x) == _SDR_SCALE * ln(x)


def _make_sdr_kernel(tile_rows, num_tiles, valid_rows, subrows):
    """Builds the streaming-reduction kernel with static tiling baked in."""
    needs_mask = num_tiles * tile_rows != valid_rows

    def accumulate(sum_ref, max_ref, contrib, absdiff):
        if subrows == 8:
            # (T, 128) -> (T/8, 8, 128) is a layout no-op; reducing the major
            # axis is a tree of full-vreg adds/maxes (no XLU work, aligned
            # 8x128 accumulator stores).
            sum_ref[...] += contrib.reshape(-1, 8, LANES).sum(axis=0)
            max_ref[...] = jnp.maximum(
                max_ref[...], absdiff.reshape(-1, 8, LANES).max(axis=0))
        else:
            # Small single-tile case (rows not a multiple of 8).
            sum_ref[...] += jnp.sum(contrib, axis=0, keepdims=True)
            max_ref[...] = jnp.maximum(
                max_ref[...], jnp.max(absdiff, axis=0, keepdims=True))

    def kernel(est_ref, orig_ref, sum_ref, max_ref):
        i = pl.program_id(0)

        @pl.when(i == 0)
        def _():
            sum_ref[...] = jnp.zeros_like(sum_ref)
            max_ref[...] = jnp.zeros_like(max_ref)

        # Native-dtype stream; upcast after the VMEM load (bf16-safe on v5e).
        est = est_ref[...].astype(jnp.float32)
        orig = orig_ref[...].astype(jnp.float32)
        diff = orig - est
        # Two EUP logs + one VALU sub; no f32 divide, no ratio overflow.
        contrib = jnp.log(orig * orig + EPS) - jnp.log(diff * diff + EPS)
        absdiff = jnp.abs(diff)

        if needs_mask:
            last = num_tiles - 1

            @pl.when(i != last)
            def _():
                accumulate(sum_ref, max_ref, contrib, absdiff)

            @pl.when(i == last)
            def _():
                # Static count of real rows inside the (ragged) final tile.
                in_tile_valid = valid_rows - last * tile_rows
                row_ids = jax.lax.broadcasted_iota(
                    jnp.int32, (tile_rows, LANES), 0)
                valid = row_ids < in_tile_valid
                accumulate(sum_ref, max_ref,
                           jnp.where(valid, contrib, 0.0),
                           jnp.where(valid, absdiff, 0.0))
        else:
            accumulate(sum_ref, max_ref, contrib, absdiff)

    return kernel


def sdr_loss(estimated_signal, original_signal):
    """Pallas TPU implementation of SDRLoss.forward (any matching shape)."""
    assert estimated_signal.shape == original_signal.shape
    est = estimated_signal.reshape(-1)
    orig = original_signal.reshape(-1)
    if not jnp.issubdtype(est.dtype, jnp.floating):
        est = est.astype(jnp.float32)
    if not jnp.issubdtype(orig.dtype, jnp.floating):
        orig = orig.astype(jnp.float32)

    n_real = est.shape[0]
    rows = n_real // LANES
    tail = n_real - rows * LANES

    log_sum = jnp.float32(0.0)
    max_absdiff = jnp.float32(0.0)

    if rows > 0:
        if tail:
            # Lane-aligned prefix only; the <128-element tail is folded in
            # below with plain jnp (no full-array pad).
            est_main = est[: rows * LANES]
            orig_main = orig[: rows * LANES]
        else:
            # Aligned case: free reshape, no copy at all.
            est_main = est
            orig_main = orig
        est2d = est_main.reshape(rows, LANES)
        orig2d = orig_main.reshape(rows, LANES)

        tile_rows = rows if rows <= MAX_TILE_ROWS else MAX_TILE_ROWS
        num_tiles = pl.cdiv(rows, tile_rows)
        subrows = 8 if tile_rows % 8 == 0 else 1

        kernel = _make_sdr_kernel(tile_rows, num_tiles, rows, subrows)

        sum_vec, max_vec = pl.pallas_call(
            kernel,
            out_shape=(
                jax.ShapeDtypeStruct((subrows, LANES), jnp.float32),
                jax.ShapeDtypeStruct((subrows, LANES), jnp.float32),
            ),
            grid_spec=pltpu.PrefetchScalarGridSpec(
                num_scalar_prefetch=0,
                grid=(num_tiles,),
                in_specs=[
                    pl.BlockSpec((tile_rows, LANES), lambda i: (i, 0)),
                    pl.BlockSpec((tile_rows, LANES), lambda i: (i, 0)),
                ],
                out_specs=(
                    pl.BlockSpec((subrows, LANES), lambda i: (0, 0)),
                    pl.BlockSpec((subrows, LANES), lambda i: (0, 0)),
                ),
            ),
            compiler_params=pltpu.CompilerParams(
                dimension_semantics=("arbitrary",),
                vmem_limit_bytes=32 * 1024 * 1024,
            ),
        )(est2d, orig2d)

        log_sum = jnp.sum(sum_vec)
        max_absdiff = jnp.max(max_vec)

    if tail:
        est_t = est[rows * LANES:].astype(jnp.float32)
        orig_t = orig[rows * LANES:].astype(jnp.float32)
        d_t = orig_t - est_t
        log_sum = log_sum + jnp.sum(
            jnp.log(orig_t * orig_t + EPS) - jnp.log(d_t * d_t + EPS))
        max_absdiff = jnp.maximum(max_absdiff, jnp.max(jnp.abs(d_t)))

    mean_sdr = _SDR_SCALE * log_sum / jnp.float32(n_real)
    # torch.equal(est, orig) -> sdr = -inf -> exp(-sdr) = +inf.
    # NaN inputs: torch.equal is False, so the NaN mean must propagate — the
    # isnan term reproduces that (jnp.maximum propagates NaN into max_absdiff).
    any_diff = (max_absdiff > 0.0) | jnp.isnan(max_absdiff)
    sdr = jnp.where(any_diff, mean_sdr, -jnp.inf)
    return jnp.exp(-sdr)


def sdr_loss_ref(estimated_signal, original_signal):
    """Pure-JAX reference (mirrors the PyTorch math) for verification."""
    est = estimated_signal.astype(jnp.float32)
    orig = original_signal.astype(jnp.float32)
    num = orig ** 2
    denom = (orig - est) ** 2
    sdr = 10.0 * (jnp.log10(num + EPS) - jnp.log10(denom + EPS))
    mean_sdr = jnp.mean(sdr)
    mean_sdr = jnp.where(jnp.all(est == orig), -jnp.inf, mean_sdr)
    return jnp.exp(-mean_sdr)


if __name__ == "__main__":
    key = jax.random.PRNGKey(0)
    k1, k2 = jax.random.split(key)

    # 1) NCHW-shaped f32 signal, lane-aligned numel (2*4*16*16 = 2048).
    x_shape = (2, 4, 16, 16)
    original = jax.random.normal(k1, x_shape, dtype=jnp.float32)
    estimated = original + 0.1 * jax.random.normal(k2, x_shape, dtype=jnp.float32)
    out = jax.block_until_ready(sdr_loss(estimated, original))
    ref = sdr_loss_ref(estimated, original)
    assert jnp.allclose(out, ref, rtol=2e-3, atol=0.0), (out, ref)

    # 2) exact-equality branch -> sdr = -inf -> loss = +inf
    out_eq = jax.block_until_ready(sdr_loss(original, original))
    assert jnp.isinf(out_eq) and out_eq > 0, out_eq

    # 3) ragged numel (3*5*7*11 = 1155): kernel on the aligned prefix,
    #    <128-element tail folded in by the wrapper.
    y_shape = (3, 5, 7, 11)
    orig2 = jax.random.normal(k1, y_shape, dtype=jnp.float32)
    est2 = orig2 + 0.05 * jax.random.normal(k2, y_shape, dtype=jnp.float32)
    out2 = jax.block_until_ready(sdr_loss(est2, orig2))
    ref2 = sdr_loss_ref(est2, orig2)
    assert jnp.allclose(out2, ref2, rtol=2e-3, atol=0.0), (out2, ref2)

    # 4) bf16 inputs streamed in native dtype (in-kernel upcast).
    z_shape = (4, 8, 64)
    orig3 = jax.random.normal(k1, z_shape, dtype=jnp.bfloat16)
    est3 = (orig3.astype(jnp.float32)
            + 0.1 * jax.random.normal(k2, z_shape, dtype=jnp.float32)
            ).astype(jnp.bfloat16)
    out3 = jax.block_until_ready(sdr_loss(est3, orig3))
    ref3 = sdr_loss_ref(est3, orig3)
    assert jnp.allclose(out3, ref3, rtol=2e-3, atol=0.0), (out3, ref3)

    # 5) multi-tile path with a ragged, gated-mask last tile (rows = 4100).
    w_shape = (4100, 128)
    orig4 = jax.random.normal(k1, w_shape, dtype=jnp.float32)
    est4 = orig4 + 0.1 * jax.random.normal(k2, w_shape, dtype=jnp.float32)
    out4 = jax.block_until_ready(sdr_loss(est4, orig4))
    ref4 = sdr_loss_ref(est4, orig4)
    assert jnp.allclose(out4, ref4, rtol=2e-3, atol=0.0), (out4, ref4)

    print("KERNEL_OK")
</pallas_src>

<mosaic_0001>
module attributes {stable_mosaic.version = 11 : i64} {
  func.func @kernel(%arg0: i32, %arg1: memref<16x128xf32, #tpu.memory_space<vmem>>, %arg2: memref<16x128xf32, #tpu.memory_space<vmem>>, %arg3: memref<8x128xf32, #tpu.memory_space<vmem>>, %arg4: memref<8x128xf32, #tpu.memory_space<vmem>>) attributes {dimension_semantics = [#tpu.dimension_semantics<arbitrary>], iteration_bounds = array<i64: 1>, scalar_prefetch = 0 : i64, scratch_operands = 0 : i64, tpu.core_type = #tpu.core_type<tc>, window_params = [{transform_indices = @transform_0, window_bounds = array<i64: 16, 128>}, {transform_indices = @transform_1, window_bounds = array<i64: 16, 128>}, {pipeline_mode = #tpu.pipeline_mode<synchronous>, transform_indices = @transform_2, window_bounds = array<i64: 8, 128>}, {pipeline_mode = #tpu.pipeline_mode<synchronous>, transform_indices = @transform_3, window_bounds = array<i64: 8, 128>}]} {
    %c0_i32 = arith.constant 0 : i32
    %0 = arith.cmpi eq, %arg0, %c0_i32 : i32
    %1 = arith.extui %0 : i1 to i32
    %c0_i32_0 = arith.constant 0 : i32
    %2 = arith.cmpi ne, %1, %c0_i32_0 : i32
    scf.if %2 {
      %cst_15 = arith.constant 0.000000e+00 : f32
      %26 = vector.broadcast %cst_15 : f32 to vector<8x128xf32>
      %c0_16 = arith.constant 0 : index
      %c0_17 = arith.constant 0 : index
      %27 = vector.load %arg3[%c0_16, %c0_17] : memref<8x128xf32, #tpu.memory_space<vmem>>, vector<8x128xf32>
      tpu.vector_store %arg3[%c0_16, %c0_17], %26 {strides = array<i32>} : memref<8x128xf32, #tpu.memory_space<vmem>>, vector<8x128xf32>,
      %cst_18 = arith.constant 0.000000e+00 : f32
      %28 = vector.broadcast %cst_18 : f32 to vector<8x128xf32>
      %c0_19 = arith.constant 0 : index
      %c0_20 = arith.constant 0 : index
      %29 = vector.load %arg4[%c0_19, %c0_20] : memref<8x128xf32, #tpu.memory_space<vmem>>, vector<8x128xf32>
      tpu.vector_store %arg4[%c0_19, %c0_20], %28 {strides = array<i32>} : memref<8x128xf32, #tpu.memory_space<vmem>>, vector<8x128xf32>,
    } else {
    }
    %c0 = arith.constant 0 : index
    %c0_1 = arith.constant 0 : index
    %3 = vector.load %arg1[%c0, %c0_1] : memref<16x128xf32, #tpu.memory_space<vmem>>, vector<16x128xf32>
    %c0_2 = arith.constant 0 : index
    %c0_3 = arith.constant 0 : index
    %4 = vector.load %arg2[%c0_2, %c0_3] : memref<16x128xf32, #tpu.memory_space<vmem>>, vector<16x128xf32>
    %5 = arith.subf %4, %3 : vector<16x128xf32>
    %6 = arith.mulf %4, %4 : vector<16x128xf32>
    %cst = arith.constant 9.99999993E-9 : f32
    %7 = vector.broadcast %cst : f32 to vector<16x128xf32>
    %8 = arith.addf %6, %7 : vector<16x128xf32>
    %9 = math.log %8 : vector<16x128xf32>
    %10 = arith.mulf %5, %5 : vector<16x128xf32>
    %cst_4 = arith.constant 9.99999993E-9 : f32
    %11 = vector.broadcast %cst_4 : f32 to vector<16x128xf32>
    %12 = arith.addf %10, %11 : vector<16x128xf32>
    %13 = math.log %12 : vector<16x128xf32>
    %14 = arith.subf %9, %13 : vector<16x128xf32>
    %15 = math.absf %5 : vector<16x128xf32>
    %c0_5 = arith.constant 0 : index
    %c0_6 = arith.constant 0 : index
    %16 = vector.load %arg3[%c0_5, %c0_6] : memref<8x128xf32, #tpu.memory_space<vmem>>, vector<8x128xf32>
    %17 = vector.shape_cast %14 : vector<16x128xf32> to vector<2x8x128xf32>
    %cst_7 = arith.constant dense<0.000000e+00> : vector<8x128xf32>
    %18 = vector.multi_reduction <add>, %17, %cst_7 [0] : vector<2x8x128xf32> to vector<8x128xf32>
    %19 = arith.addf %16, %18 : vector<8x128xf32>
    %c0_8 = arith.constant 0 : index
    %c0_9 = arith.constant 0 : index
    %20 = vector.load %arg3[%c0_8, %c0_9] : memref<8x128xf32, #tpu.memory_space<vmem>>, vector<8x128xf32>
    tpu.vector_store %arg3[%c0_8, %c0_9], %19 {strides = array<i32>} : memref<8x128xf32, #tpu.memory_space<vmem>>, vector<8x128xf32>,
    %c0_10 = arith.constant 0 : index
    %c0_11 = arith.constant 0 : index
    %21 = vector.load %arg4[%c0_10, %c0_11] : memref<8x128xf32, #tpu.memory_space<vmem>>, vector<8x128xf32>
    %22 = vector.shape_cast %15 : vector<16x128xf32> to vector<2x8x128xf32>
    %cst_12 = arith.constant dense<0xFF800000> : vector<8x128xf32>
    %23 = vector.multi_reduction <maximumf>, %22, %cst_12 [0] : vector<2x8x128xf32> to vector<8x128xf32>
    %24 = arith.maximumf %21, %23 : vector<8x128xf32>
    %c0_13 = arith.constant 0 : index
    %c0_14 = arith.constant 0 : index
    %25 = vector.load %arg4[%c0_13, %c0_14] : memref<8x128xf32, #tpu.memory_space<vmem>>, vector<8x128xf32>
    tpu.vector_store %arg4[%c0_13, %c0_14], %24 {strides = array<i32>} : memref<8x128xf32, #tpu.memory_space<vmem>>, vector<8x128xf32>,
    return
  }
  func.func @transform_0(%arg0: i32) -> (i32, i32) {
    %c0_i32 = arith.constant 0 : i32
    %c0_i32_0 = arith.constant 0 : i32
    return %arg0, %c0_i32 : i32, i32
  }
  func.func @transform_1(%arg0: i32) -> (i32, i32) {
    %c0_i32 = arith.constant 0 : i32
    %c0_i32_0 = arith.constant 0 : i32
    return %arg0, %c0_i32 : i32, i32
  }
  func.func @transform_2(%arg0: i32) -> (i32, i32) {
    %c0_i32 = arith.constant 0 : i32
    %c0_i32_0 = arith.constant 0 : i32
    %c0_i32_1 = arith.constant 0 : i32
    return %c0_i32, %c0_i32_0 : i32, i32
  }
  func.func @transform_3(%arg0: i32) -> (i32, i32) {
    %c0_i32 = arith.constant 0 : i32
    %c0_i32_0 = arith.constant 0 : i32
    %c0_i32_1 = arith.constant 0 : i32
    return %c0_i32, %c0_i32_0 : i32, i32
  }
}

</mosaic_0001>

<bundles_post_ra>
// kernel: tpu_custom_call.1
= control target key start
LH: loop header
LB: loop body
LE: loop exit
PB: predicated region body
PF: predicated region fallthrough
CT: control target
= control target key end

     0   :  { %9 = vsyncpa [#allocation3], 0  ;;  %s254_s0 = inlined_call_operand.hbm [shape: f32[16,128], index: 0, kind: input, shape index: {}]   ;;  %s255_s1 = inlined_call_operand.hbm [shape: f32[16,128], index: 1, kind: input, shape index: {}]   ;;  %s256_s2 = inlined_call_operand.hbm [shape: f32[8,128], index: 2, kind: output, shape index: {0}]   ;;  %s257_s3 = inlined_call_operand.hbm [shape: f32[8,128], index: 3, kind: output, shape index: {1}]  }
   0x1   :  { %10 = vsyncpa [#allocation6], 0 }
   0x2   :  { %11 = vsyncpa [#allocation4], 0 }
   0x3   :  { %12 = vsyncpa [#allocation9], 0  ;;  %s216_s12 = smov [#allocation2]  }
   0x4   :  { %s18_s13 = sshll.u32 %s216_s12, 4  ;;  %s19_s13 = int_to_ptr.vmem [resolvable:$true] %s18_s13 }
   0x5   :  { %s136_s14 = scalar_lea.vmem %s19_s13, 256  ;;  %p141_p1 = scmp.lt.s32.totalorder %s19_s13, %s19_s13 }
   0x6   :  { %p137_p0 = scmp.ne.s32.totalorder %s19_s13, %s136_s14  ;;  %p142_p2 = scmp.lt.s32.totalorder %s136_s14, %s136_s14 }
   0x8   :  { %p143_p3 = por %p142_p2, %p141_p1 }
   0xa   :  { %p144_p4 = pnand %p143_p3, %p137_p0 }
   0xc   :  { %147 = shalt.err (!%p144_p4)
}
   0xd   :  { %s217_s15 = smov 128   ;;  %s218_s16 = smov 8  }
   0xe   :  { %24 = dma.hbm_to_vmem [thread:$0]  %s254_s0, 256, %s19_s13, [#allocation3], %s217_s15, %s217_s15, %s218_s16  }
   0xf   :  { %s219_s19 = smov [#allocation5]  }
  0x10   :  { %s30_s20 = sshll.u32 %s219_s19, 4  ;;  %s31_s20 = int_to_ptr.vmem [resolvable:$true] %s30_s20 }
  0x11   :  { %s156_s21 = scalar_lea.vmem %s31_s20, 256  ;;  %p161_p6 = scmp.lt.s32.totalorder %s31_s20, %s31_s20 }
  0x12   :  { %p157_p5 = scmp.ne.s32.totalorder %s31_s20, %s156_s21  ;;  %p162_p7 = scmp.lt.s32.totalorder %s156_s21, %s156_s21 }
  0x14   :  { %p163_p8 = por %p162_p7, %p161_p6 }
  0x16   :  { %p164_p9 = pnand %p163_p8, %p157_p5 }
  0x18   :  { %167 = shalt.err (!%p164_p9)
}
  0x19   :  { %36 = dma.hbm_to_vmem [thread:$0]  %s255_s1, 256, %s31_s20, [#allocation6], %s217_s15, %s217_s15, %s218_s16  }
  0x1a   :  { %208 = dma.done.wait [#allocation3], 256  }
  0x1b   :  { %209 = vsyncadd [#allocation3], 4294967040 }
  0x1c   :  { %210 = dma.done.wait [#allocation6], 256  }
  0x1d   :  { %211 = vsyncadd [#allocation6], 4294967040  ;;  %v49_v0 = vld [vmem:[#allocation2] sm:$0xff]  ;;  %v50_v1 = vld [vmem:[#allocation2 + $0x8] sm:$0xff]  ;;  %s220_s0 = smov [#allocation8]  }
  0x1e   :  { %v51_v2 = vld [vmem:[#allocation5] sm:$0xff]  ;;  %v52_v3 = vld [vmem:[#allocation5 + $0x8] sm:$0xff]  ;;  %s99_s1 = sshll.u32 %s220_s0, 4  ;;  %s100_s1 = int_to_ptr.vmem [resolvable:$true] %s99_s1 }
  0x1f   :  { %v53_v4 = vsub.f32 %v51_v2, %v49_v0  ;;  %v55_v5 = vmul.f32 %v51_v2, %v51_v2  ;;  %v54_v6 = vsub.f32 %v52_v3, %v50_v1  ;;  %v56_v7 = vmul.f32 %v52_v3, %v52_v3  ;;  %s168_s24 = scalar_lea.vmem %s100_s1, 128  ;;  %p173_p11 = scmp.lt.s32.totalorder %s100_s1, %s100_s1 }
  0x20   :  { %p169_p10 = scmp.ne.s32.totalorder %s100_s1, %s168_s24  ;;  %p174_p12 = scmp.lt.s32.totalorder %s168_s24, %s168_s24 }
  0x21   :  { %v57_v8 = vadd.f32 1e-08, %v55_v5  ;;  %v63_v9 = vmul.f32 %v53_v4, %v53_v4  ;;  %v73_v10 = vand.u32 2147483647, %v53_v4  ;;  %v58_v11 = vadd.f32 1e-08, %v56_v7 }
  0x22   :  { %v64_v12 = vmul.f32 %v54_v6, %v54_v6  ;;  %v74_v13 = vand.u32 2147483647, %v54_v6  ;;  %p175_p13 = por %p174_p12, %p173_p11 }
  0x23   :  { %120 = vlog2.f32 %v57_v8  ;;  %v65_v14 = vadd.f32 1e-08, %v63_v9 }
  0x24   :  { %122 = vlog2.f32 %v58_v11  ;;  %v66_v15 = vadd.f32 1e-08, %v64_v12  ;;  %v80_v16 = vmax.f32.f32 %v73_v10, %v74_v13  ;;  %p176_p0 = pnand %p175_p13, %p169_p10 }
  0x25   :  { %124 = vlog2.f32 %v65_v14 }
  0x26   :  { %126 = vlog2.f32 %v66_v15  ;;  %v81_v17 = vmax.f32 %v80_v16, 0.0 }
  0x28   :  { %82 = vst [vmem:[#allocation8] sm:$0xff] %v81_v17 }
  0x29   :  { %179 = shalt.err (!%p176_p0)
}
  0x2a   :  { %102 = dma.vmem_to_hbm [thread:$0]  %s100_s1, 128, %s257_s3, [#allocation9]  }
  0x2b   :  { %s221_s27 = smov [#allocation7]  }
  0x2c   :  { %s89_s28 = sshll.u32 %s221_s27, 4  ;;  %s90_s28 = int_to_ptr.vmem [resolvable:$true] %s89_s28 }
  0x2d   :  { %s188_s29 = scalar_lea.vmem %s90_s28, 128  ;;  %p193_p2 = scmp.lt.s32.totalorder %s90_s28, %s90_s28 }
  0x2e   :  { %p189_p1 = scmp.ne.s32.totalorder %s90_s28, %s188_s29  ;;  %p194_p3 = scmp.lt.s32.totalorder %s188_s29, %s188_s29 }
  0x30   :  { %v121_v18 = vpop.eup %120  ;;  %p195_p4 = por %p194_p3, %p193_p2 }
  0x31   :  { %v123_v19 = vpop.eup %122  ;;  %v60_v20 = vmul.f32 0.6931472, %v121_v18 }
  0x32   :  { %v125_v21 = vpop.eup %124  ;;  %v62_v22 = vmul.f32 0.6931472, %v123_v19  ;;  %p196_p5 = pnand %p195_p4, %p189_p1 }
  0x33   :  { %v127_v23 = vpop.eup %126  ;;  %v68_v24 = vmul.f32 0.6931472, %v125_v21 }
  0x34   :  { %v70_v25 = vmul.f32 0.6931472, %v127_v23 }
  0x35   :  { %v71_v26 = vsub.f32 %v60_v20, %v68_v24 }
  0x36   :  { %v72_v27 = vsub.f32 %v62_v22, %v70_v25 }
  0x38   :  { %v76_v28 = vadd.f32 %v72_v27, %v71_v26 }
  0x3a   :  { %78 = vst [vmem:[#allocation7] sm:$0xff] %v76_v28 }
  0x3b   :  { %199 = shalt.err (!%p196_p5)
}
  0x3c   :  { %92 = dma.vmem_to_hbm [thread:$0]  %s90_s28, 128, %s256_s2, [#allocation4]  }
  0x3d   :  { %212 = dma.done.wait [#allocation4], 128  }
  0x3e   :  { %213 = vsyncadd [#allocation4], 4294967168 }
  0x3f   :  { %214 = dma.done.wait [#allocation9], 128  }
  0x40   :  { %215 = vsyncadd [#allocation9], 4294967168 }
  0x41   :  { %109 = vsyncpa [#allocation3], 1 }
  0x42   :  { %110 = vsyncpa [#allocation6], 1 }
  0x43   :  { %111 = vsyncpa [#allocation4], 1 }
  0x44   :  { %112 = vsyncpa [#allocation9], 1 }

</bundles_post_ra>
